<compile_context>
chip_gen: v7x
topology: tpu7x:2x2x1
jax: 0.10.0
libtpu: 0.0.40
codegen_flags: <defaults>
</compile_context>

<pallas_src>
import math
import functools

import jax
import jax.numpy as jnp
from jax.experimental import pallas as pl
from jax.experimental.pallas import tpu as pltpu


# --------------------------------------------------------------------------- #
# Tiling helpers
# --------------------------------------------------------------------------- #
def _round_up(a, b):
    return (a + b - 1) // b * b


def _row_fold(num_channels):
    """Smallest (bt, rows) with rows = bt * C a multiple of 8 (f32 sublanes)."""
    rows = num_channels
    while rows % 8 != 0:
        rows += num_channels
    return rows // num_channels, rows


def _choose_hw_tiling(hw, rows, target_block_bytes=2 << 20):
    """Lane-dense spatial tile sized from a VMEM byte budget (not a fixed 4096)."""
    hw128 = _round_up(hw, 128)
    max_tile = max(128, (target_block_bytes // (rows * 4)) // 128 * 128)
    n_steps = -(-hw128 // max_tile)                      # cdiv
    tile = _round_up(-(-hw128 // n_steps), 128)
    return tile, n_steps, tile * n_steps                 # (hw_tile, n_steps, hw_pad)


def _split_outer(n_steps):
    """Split hw steps into (parallel outer, arbitrary inner) for v7x megacore."""
    for cand in (4, 2):
        if n_steps % cand == 0:
            return cand, n_steps // cand
    return 1, n_steps


# --------------------------------------------------------------------------- #
# Kernel
# --------------------------------------------------------------------------- #
def _elemwise_channel_exp_kernel(x_ref, w_ref, off_ref, out_ref, dld_ref, *,
                                 width, hw_total, num_channels, n_inner,
                                 permute, has_tail):
    """One grid step processes one (row-block, hw-tile) slab.

    x_ref  : (rows, hw_tile)     rows = BT batches x C channels, f32
    w_ref  : (rows, rows)        block-diagonal channel-mixing weight (shared)
    off_ref: (rows, 1)           per-row channel offset (shared)
    out_ref: (rows, hw_tile)     out_final slab
    dld_ref: (1, 1, rows, 1)     per-(row-block, hw-chunk) log-sum accumulator,
                                 resident across the inner ("arbitrary") hw axis
    """
    i = pl.program_id(2)
    rows, hw_tile = x_ref.shape

    @pl.when(i == 0)
    def _init():
        dld_ref[...] = jnp.zeros_like(dld_ref)

    x = x_ref[...]
    wmat = w_ref[...]
    off = off_ref[...]

    # ---- checkerboard mask from parity iotas (no HBM mask stream) ---------- #
    hw0 = (pl.program_id(1) * n_inner + i) * hw_tile
    hw_idx = hw0 + jax.lax.broadcasted_iota(jnp.int32, (1, hw_tile), 1)
    if width % 2 == 1:
        sp = hw_idx                                      # h + w == hw (mod 2)
    elif (width & (width - 1)) == 0:
        sp = (hw_idx >> (width.bit_length() - 1)) ^ hw_idx
    else:
        sp = (hw_idx // width) + hw_idx                  # only on (1, hw_tile)
    p_hw = sp & 1                                        # parity of h + w

    row = jax.lax.broadcasted_iota(jnp.int32, (rows, 1), 0)
    p_c = (row % num_channels) & 1                       # channel parity per row
    parity = p_hw ^ p_c                                  # (rows, hw_tile) in {0,1}
    if permute:
        parity = parity ^ 1
    keep = parity == 0                                   # checkerboard mask == 1

    # ---- 1x1 conv == block-diagonal channel-mixing matmul on the MXU ------- #
    xm = jnp.where(keep, x, 0.0)                         # z * mask
    z = jnp.dot(wmat, xm, preferred_element_type=jnp.float32) + off

    # ---- numerically stable sigmoid; exact reciprocal since it feeds log --- #
    e = jnp.exp(-jnp.abs(z))                             # in (0, 1], never inf
    r = 1.0 / (1.0 + e)
    out = jnp.where(z >= 0, r, e * r) + 0.001            # strictly > 0

    out_ref[...] = jnp.where(keep, x, x * out).astype(out_ref.dtype)

    # ---- dlogdet partial: sum(log(out)) over non-kept, in-bounds positions - #
    contrib = jnp.logical_not(keep)
    if has_tail:                                         # padded spatial tail
        contrib = jnp.logical_and(contrib, hw_idx < hw_total)
    partial = jnp.sum(jnp.where(contrib, jnp.log(out), 0.0),
                      axis=1, keepdims=True)             # (rows, 1)
    dld_ref[...] += partial.reshape(1, 1, rows, 1)


# --------------------------------------------------------------------------- #
# Wrapper
# --------------------------------------------------------------------------- #
@functools.partial(jax.jit, static_argnames=("permute",))
def elementwise_channel_exp_forward(x, weight, channel_offset, logdet=0.0,
                                    permute=False):
    """Forward pass (reverse=False) of Elementwise_channel_exp.

    x:              [B, C, H, W]
    weight:         [C, C, 1, 1]
    channel_offset: [1, C, 1, 1]
    Returns (out_final [B,C,H,W] float32, logdet [B] float32).
    """
    B, C, H, W = x.shape
    HW = H * W

    bt, rows = _row_fold(C)                    # rows = bt*C, multiple of 8
    b_pad = _round_up(B, bt)
    n_rb = b_pad // bt

    hw_tile, n_steps, hw_pad = _choose_hw_tiling(HW, rows)
    n_outer, n_inner = _split_outer(n_steps)
    has_tail = hw_pad != HW

    # ---- host-side layout plumbing (lane-dense, sublane-full slab) --------- #
    x_flat = x.reshape(B, C, HW).astype(jnp.float32)
    x_flat = jnp.pad(x_flat, ((0, b_pad - B), (0, 0), (0, hw_pad - HW)))
    x2 = x_flat.reshape(b_pad * C, hw_pad)

    w2 = weight.reshape(C, C).astype(jnp.float32)
    w_bd = jnp.kron(jnp.eye(bt, dtype=jnp.float32), w2)              # (rows, rows)
    off_rows = jnp.tile(channel_offset.reshape(C, 1).astype(jnp.float32), (bt, 1))

    kernel = functools.partial(
        _elemwise_channel_exp_kernel,
        width=W, hw_total=HW, num_channels=C, n_inner=n_inner,
        permute=bool(permute), has_tail=has_tail)

    # Advisory cost hint so XLA can schedule around the kernel.
    g = b_pad * C
    cost = pl.CostEstimate(
        flops=2 * g * rows * hw_pad + 10 * g * hw_pad,
        transcendentals=2 * g * hw_pad,
        bytes_accessed=2 * g * hw_pad * 4,
    )

    out2, dld = pl.pallas_call(
        kernel,
        grid=(n_rb, n_outer, n_inner),
        in_specs=[
            pl.BlockSpec((rows, hw_tile), lambda rb, o, i: (rb, o * n_inner + i)),
            pl.BlockSpec((rows, rows), lambda rb, o, i: (0, 0)),
            pl.BlockSpec((rows, 1), lambda rb, o, i: (0, 0)),
        ],
        out_specs=[
            pl.BlockSpec((rows, hw_tile), lambda rb, o, i: (rb, o * n_inner + i)),
            pl.BlockSpec((1, 1, rows, 1), lambda rb, o, i: (rb, o, 0, 0)),
        ],
        out_shape=(
            jax.ShapeDtypeStruct((b_pad * C, hw_pad), jnp.float32),
            jax.ShapeDtypeStruct((n_rb, n_outer, rows, 1), jnp.float32),
        ),
        compiler_params=pltpu.CompilerParams(
            # row-blocks and outer hw chunks are independent -> megacore-parallel
            # on v7x; inner hw axis carries the dlogdet accumulation.
            dimension_semantics=("parallel", "parallel", "arbitrary"),
            vmem_limit_bytes=32 * 1024 * 1024,
        ),
        cost_estimate=cost,
    )(x2, w_bd, off_rows)

    out_final = out2.reshape(b_pad, C, hw_pad)[:B, :, :HW].reshape(B, C, H, W)

    # Per-batch dlogdet: sum outer hw chunks, then group rows -> (batch, channel).
    dld_rows = jnp.sum(dld, axis=1)[..., 0]                       # (n_rb, rows)
    dlogdet = jnp.sum(dld_rows.reshape(n_rb, bt, C), axis=2).reshape(b_pad)[:B]

    return out_final, logdet + dlogdet


# --------------------------------------------------------------------------- #
# Parameter init (matches the module's __init__ shapes) and a pure-JAX ref
# --------------------------------------------------------------------------- #
def init_params(key, num_channels):
    """weight: [C,C,1,1] ~ kaiming_uniform_(a=sqrt(5)); offset: ones [1,C,1,1]."""
    fan_in = num_channels
    gain = math.sqrt(2.0 / (1.0 + 5.0))
    bound = gain * math.sqrt(3.0 / fan_in)
    weight = jax.random.uniform(
        key, (num_channels, num_channels, 1, 1),
        minval=-bound, maxval=bound, dtype=jnp.float32)
    channel_offset = jnp.ones((1, num_channels, 1, 1), dtype=jnp.float32)
    return weight, channel_offset


def _reference_forward(x, weight, channel_offset, logdet=0.0, permute=False):
    B, C, H, W = x.shape
    ci = jnp.arange(C)[:, None, None]
    hi = jnp.arange(H)[None, :, None]
    wi = jnp.arange(W)[None, None, :]
    mask = (1 - (ci + hi + wi) % 2).astype(jnp.float32)
    if permute:
        mask = 1.0 - mask
    w2 = weight.reshape(C, C).astype(jnp.float32)
    conv = jnp.einsum('oc,bchw->bohw', w2, x * mask,
                      precision=jax.lax.Precision.HIGHEST)
    out = jax.nn.sigmoid(conv + channel_offset.reshape(1, C, 1, 1)) + 0.001
    out_final = x * (1.0 - mask) * out + x * mask
    dlog = jnp.sum(jnp.where(mask == 0, jnp.log(out), 0.0), axis=(1, 2, 3))
    return out_final, logdet + dlog


if __name__ == "__main__":
    key = jax.random.PRNGKey(0)
    k_x, k_w = jax.random.split(key)

    B, C, H, W = 2, 4, 16, 16
    x = jax.random.normal(k_x, (B, C, H, W), dtype=jnp.float32)
    weight, channel_offset = init_params(k_w, C)

    for permute in (False, True):
        out_final, logdet = elementwise_channel_exp_forward(
            x, weight, channel_offset, logdet=0.0, permute=permute)
        jax.block_until_ready((out_final, logdet))

        ref_out, ref_logdet = _reference_forward(
            x, weight, channel_offset, logdet=0.0, permute=permute)

        assert out_final.shape == (B, C, H, W)
        assert logdet.shape == (B,)
        assert bool(jnp.all(jnp.isfinite(out_final)))
        assert bool(jnp.all(jnp.isfinite(logdet)))
        assert bool(jnp.allclose(out_final, ref_out, rtol=1e-4, atol=1e-4)), (
            "out_final mismatch:", float(jnp.max(jnp.abs(out_final - ref_out))))
        assert bool(jnp.allclose(logdet, ref_logdet, rtol=1e-3, atol=1e-3)), (
            "logdet mismatch:", float(jnp.max(jnp.abs(logdet - ref_logdet))))

    print("KERNEL_OK")
</pallas_src>

<mosaic_0001>
module attributes {stable_mosaic.version = 11 : i64} {
  func.func @_elemwise_channel_exp_kernel(%arg0: i32, %arg1: i32, %arg2: i32, %arg3: memref<8x256xf32, #tpu.memory_space<vmem>>, %arg4: memref<8x8xf32, #tpu.memory_space<vmem>>, %arg5: memref<8x1xf32, #tpu.memory_space<vmem>>, %arg6: memref<8x256xf32, #tpu.memory_space<vmem>>, %arg7: memref<1x1x8x1xf32, #tpu.memory_space<vmem>>) attributes {dimension_semantics = [#tpu.dimension_semantics<parallel>, #tpu.dimension_semantics<parallel>, #tpu.dimension_semantics<arbitrary>], iteration_bounds = array<i64: 1, 1, 1>, scalar_prefetch = 0 : i64, scratch_operands = 0 : i64, tpu.core_type = #tpu.core_type<tc>, window_params = [{transform_indices = @transform_0, window_bounds = array<i64: 8, 256>}, {pipeline_mode = #tpu.pipeline_mode<synchronous>, transform_indices = @transform_1, window_bounds = array<i64: 8, 8>}, {pipeline_mode = #tpu.pipeline_mode<synchronous>, transform_indices = @transform_2, window_bounds = array<i64: 8, 1>}, {transform_indices = @transform_3, window_bounds = array<i64: 8, 256>}, {transform_indices = @transform_4, window_bounds = array<i64: 1, 1, 8, 1>}]} {
    %c0_i32 = arith.constant 0 : i32
    %0 = arith.cmpi eq, %arg2, %c0_i32 : i32
    %1 = arith.extui %0 : i1 to i32
    %c0_i32_0 = arith.constant 0 : i32
    %2 = arith.cmpi ne, %1, %c0_i32_0 : i32
    scf.if %2 {
      %cst_34 = arith.constant 0.000000e+00 : f32
      %73 = vector.broadcast %cst_34 : f32 to vector<1x1x8x1xf32>
      %c0_35 = arith.constant 0 : index
      %c0_36 = arith.constant 0 : index
      %c0_37 = arith.constant 0 : index
      %c0_38 = arith.constant 0 : index
      %74 = vector.load %arg7[%c0_35, %c0_36, %c0_37, %c0_38] : memref<1x1x8x1xf32, #tpu.memory_space<vmem>>, vector<1x1x8x1xf32>
      tpu.vector_store %arg7[%c0_35, %c0_36, %c0_37, %c0_38], %73 {strides = array<i32>} : memref<1x1x8x1xf32, #tpu.memory_space<vmem>>, vector<1x1x8x1xf32>,
    } else {
    }
    %c0 = arith.constant 0 : index
    %c0_1 = arith.constant 0 : index
    %3 = vector.load %arg3[%c0, %c0_1] : memref<8x256xf32, #tpu.memory_space<vmem>>, vector<8x256xf32>
    %c0_2 = arith.constant 0 : index
    %c0_3 = arith.constant 0 : index
    %4 = vector.load %arg4[%c0_2, %c0_3] : memref<8x8xf32, #tpu.memory_space<vmem>>, vector<8x8xf32>
    %c0_4 = arith.constant 0 : index
    %c0_5 = arith.constant 0 : index
    %5 = vector.load %arg5[%c0_4, %c0_5] : memref<8x1xf32, #tpu.memory_space<vmem>>, vector<8x1xf32>
    %c1_i32 = arith.constant 1 : i32
    %6 = arith.muli %arg1, %c1_i32 : i32
    %7 = arith.addi %6, %arg2 : i32
    %c256_i32 = arith.constant 256 : i32
    %8 = arith.muli %7, %c256_i32 : i32
    %9 = tpu.iota {dimensions = array<i32: 1>} : vector<1x256xi32>
    %10 = vector.broadcast %8 : i32 to vector<1x256xi32>
    %11 = arith.addi %10, %9 : vector<1x256xi32>
    %c4_i32 = arith.constant 4 : i32
    %12 = vector.broadcast %c4_i32 : i32 to vector<1x256xi32>
    %13 = arith.shrsi %11, %12 : vector<1x256xi32>
    %14 = arith.xori %13, %11 : vector<1x256xi32>
    %c1_i32_6 = arith.constant 1 : i32
    %15 = vector.broadcast %c1_i32_6 : i32 to vector<1x256xi32>
    %16 = arith.andi %14, %15 : vector<1x256xi32>
    %17 = tpu.iota {dimensions = array<i32: 0>} : vector<8x1xi32>
    %c4_i32_7 = arith.constant 4 : i32
    %c0_i32_8 = arith.constant 0 : i32
    %18 = arith.cmpi eq, %c4_i32_7, %c0_i32_8 : i32
    %c1_i32_9 = arith.constant 1 : i32
    %19 = arith.select %18, %c1_i32_9, %c4_i32_7 : i32
    %20 = vector.broadcast %19 : i32 to vector<8x1xi32>
    %21 = arith.remsi %17, %20 : vector<8x1xi32>
    %c0_i32_10 = arith.constant 0 : i32
    %22 = vector.broadcast %c0_i32_10 : i32 to vector<8x1xi32>
    %23 = arith.cmpi ne, %21, %22 : vector<8x1xi32>
    %c0_i32_11 = arith.constant 0 : i32
    %24 = vector.broadcast %c0_i32_11 : i32 to vector<8x1xi32>
    %25 = arith.cmpi slt, %21, %24 : vector<8x1xi32>
    %c0_i32_12 = arith.constant 0 : i32
    %26 = arith.cmpi slt, %19, %c0_i32_12 : i32
    %27 = vector.broadcast %26 : i1 to vector<8x1xi1>
    %28 = vector.broadcast %27 : vector<8x1xi1> to vector<8x1xi1>
    %29 = arith.xori %25, %28 : vector<8x1xi1>
    %30 = arith.andi %29, %23 : vector<8x1xi1>
    %31 = vector.broadcast %19 : i32 to vector<8x1xi32>
    %32 = arith.addi %21, %31 : vector<8x1xi32>
    %33 = arith.select %30, %32, %21 : vector<8x1xi1>, vector<8x1xi32>
    %c1_i32_13 = arith.constant 1 : i32
    %34 = vector.broadcast %c1_i32_13 : i32 to vector<8x1xi32>
    %35 = arith.andi %33, %34 : vector<8x1xi32>
    %36 = vector.broadcast %16 : vector<1x256xi32> to vector<8x256xi32>
    %37 = vector.broadcast %35 : vector<8x1xi32> to vector<8x256xi32>
    %38 = arith.xori %36, %37 : vector<8x256xi32>
    %c0_i32_14 = arith.constant 0 : i32
    %39 = vector.broadcast %c0_i32_14 : i32 to vector<8x256xi32>
    %40 = arith.cmpi eq, %38, %39 : vector<8x256xi32>
    %cst = arith.constant 0.000000e+00 : f32
    %41 = vector.broadcast %cst : f32 to vector<8x256xf32>
    %42 = arith.select %40, %3, %41 : vector<8x256xi1>, vector<8x256xf32>
    %cst_15 = arith.constant dense<0.000000e+00> : vector<8x256xf32>
    %43 = tpu.matmul %4, %42, %cst_15 {dimension_numbers = #tpu.dot_dimension_numbers<[1], [0], [0], [1], [0, 0, 1, 1], [], []>} : vector<8x8xf32>, vector<8x256xf32>, vector<8x256xf32> -> vector<8x256xf32>
    %44 = vector.broadcast %5 : vector<8x1xf32> to vector<8x256xf32>
    %45 = arith.addf %43, %44 : vector<8x256xf32>
    %46 = math.absf %45 : vector<8x256xf32>
    %cst_16 = arith.constant 0.000000e+00 : f32
    %47 = vector.broadcast %cst_16 : f32 to vector<8x256xf32>
    %48 = arith.subf %47, %46 : vector<8x256xf32>
    %49 = math.exp %48 : vector<8x256xf32>
    %cst_17 = arith.constant 1.000000e+00 : f32
    %50 = vector.broadcast %cst_17 : f32 to vector<8x256xf32>
    %51 = arith.addf %50, %49 : vector<8x256xf32>
    %cst_18 = arith.constant 1.000000e+00 : f32
    %52 = vector.broadcast %cst_18 : f32 to vector<8x256xf32>
    %53 = arith.divf %52, %51 : vector<8x256xf32>
    %cst_19 = arith.constant 0.000000e+00 : f32
    %54 = vector.broadcast %cst_19 : f32 to vector<8x256xf32>
    %55 = arith.cmpf oge, %45, %54 : vector<8x256xf32>
    %56 = arith.mulf %49, %53 : vector<8x256xf32>
    %57 = arith.select %55, %53, %56 : vector<8x256xi1>, vector<8x256xf32>
    %cst_20 = arith.constant 1.000000e-03 : f32
    %58 = vector.broadcast %cst_20 : f32 to vector<8x256xf32>
    %59 = arith.addf %57, %58 : vector<8x256xf32>
    %60 = arith.mulf %3, %59 : vector<8x256xf32>
    %61 = arith.select %40, %3, %60 : vector<8x256xi1>, vector<8x256xf32>
    %c0_21 = arith.constant 0 : index
    %c0_22 = arith.constant 0 : index
    %62 = vector.load %arg6[%c0_21, %c0_22] : memref<8x256xf32, #tpu.memory_space<vmem>>, vector<8x256xf32>
    tpu.vector_store %arg6[%c0_21, %c0_22], %61 {strides = array<i32>} : memref<8x256xf32, #tpu.memory_space<vmem>>, vector<8x256xf32>,
    %cst_23 = arith.constant dense<true> : vector<8x256xi1>
    %63 = arith.xori %40, %cst_23 : vector<8x256xi1>
    %64 = math.log %59 : vector<8x256xf32>
    %cst_24 = arith.constant 0.000000e+00 : f32
    %65 = vector.broadcast %cst_24 : f32 to vector<8x256xf32>
    %66 = arith.select %63, %64, %65 : vector<8x256xi1>, vector<8x256xf32>
    %cst_25 = arith.constant dense<0.000000e+00> : vector<8xf32>
    %67 = vector.multi_reduction <add>, %66, %cst_25 [1] : vector<8x256xf32> to vector<8xf32>
    %68 = vector.shape_cast %67 : vector<8xf32> to vector<8x1xf32>
    %c0_26 = arith.constant 0 : index
    %c0_27 = arith.constant 0 : index
    %c0_28 = arith.constant 0 : index
    %c0_29 = arith.constant 0 : index
    %69 = vector.load %arg7[%c0_26, %c0_27, %c0_28, %c0_29] : memref<1x1x8x1xf32, #tpu.memory_space<vmem>>, vector<1x1x8x1xf32>
    %70 = vector.shape_cast %68 : vector<8x1xf32> to vector<1x1x8x1xf32>
    %71 = arith.addf %69, %70 : vector<1x1x8x1xf32>
    %c0_30 = arith.constant 0 : index
    %c0_31 = arith.constant 0 : index
    %c0_32 = arith.constant 0 : index
    %c0_33 = arith.constant 0 : index
    %72 = vector.load %arg7[%c0_30, %c0_31, %c0_32, %c0_33] : memref<1x1x8x1xf32, #tpu.memory_space<vmem>>, vector<1x1x8x1xf32>
    tpu.vector_store %arg7[%c0_30, %c0_31, %c0_32, %c0_33], %71 {strides = array<i32>} : memref<1x1x8x1xf32, #tpu.memory_space<vmem>>, vector<1x1x8x1xf32>,
    return
  }
  func.func @transform_0(%arg0: i32, %arg1: i32, %arg2: i32) -> (i32, i32) {
    %c1_i32 = arith.constant 1 : i32
    %0 = arith.muli %arg1, %c1_i32 : i32
    %1 = arith.addi %0, %arg2 : i32
    %c0_i32 = arith.constant 0 : i32
    return %arg0, %1 : i32, i32
  }
  func.func @transform_1(%arg0: i32, %arg1: i32, %arg2: i32) -> (i32, i32) {
    %c0_i32 = arith.constant 0 : i32
    %c0_i32_0 = arith.constant 0 : i32
    %c0_i32_1 = arith.constant 0 : i32
    return %c0_i32, %c0_i32_0 : i32, i32
  }
  func.func @transform_2(%arg0: i32, %arg1: i32, %arg2: i32) -> (i32, i32) {
    %c0_i32 = arith.constant 0 : i32
    %c0_i32_0 = arith.constant 0 : i32
    %c0_i32_1 = arith.constant 0 : i32
    return %c0_i32, %c0_i32_0 : i32, i32
  }
  func.func @transform_3(%arg0: i32, %arg1: i32, %arg2: i32) -> (i32, i32) {
    %c1_i32 = arith.constant 1 : i32
    %0 = arith.muli %arg1, %c1_i32 : i32
    %1 = arith.addi %0, %arg2 : i32
    %c0_i32 = arith.constant 0 : i32
    return %arg0, %1 : i32, i32
  }
  func.func @transform_4(%arg0: i32, %arg1: i32, %arg2: i32) -> (i32, i32, i32, i32) {
    %c0_i32 = arith.constant 0 : i32
    %c0_i32_0 = arith.constant 0 : i32
    %c0_i32_1 = arith.constant 0 : i32
    return %arg0, %arg1, %c0_i32, %c0_i32_0 : i32, i32, i32, i32
  }
}

</mosaic_0001>

<bundles_post_ra>
// kernel: squeeze.1
= control target key start
LH: loop header
LB: loop body
LE: loop exit
PB: predicated region body
PF: predicated region fallthrough
CT: control target
= control target key end

     0   :  { %vm7_vm0 = vcmask 31744   ;;  %s39_s0 = inlined_call_operand.vmem [shape: f32[8], index: 0, kind: input, shape index: {}]   ;;  %s40_s1 = inlined_call_operand.vmem [shape: f32[2,4], index: 1, kind: output, shape index: {}]  }
   0x1   :  { %v4_v0 = vld [vmem:[%s39_s0] sm:$0x1]  ;;  %s22_s0 = smov 124  }
   0x2   :  { %5 = vst [vmem:[#allocation1] sm:$0x1] %v4_v0 }
   0x9   :  { %v9_v1 = vld [vmem:[#allocation1] sm:$0x1]  }
   0xa   :  { %v6_v2 = vld [vmem:[#allocation1] sm:$0x1]   ;;  %10 = vrot.lane.b32.xlu0 %v9_v1, %s22_s0 }
   0xb   :  { %8 = vst.msk [vmem:[#allocation0] sm:$0x1] %vm7_vm0, %v6_v2  }
  0x7c   :  { %v11_v3 = vpop.permute.xlu0 %10  }
  0x7d   :  { %14 = vst.msk [vmem:[#allocation0 + $0x1] sm:$0x1] %vm7_vm0, %v11_v3  }
  0x84   :  { %v18_v4 = vld [vmem:[#allocation0] sm:$0x3] }
  0x85   :  { %20 = vst [vmem:[%s40_s1] sm:$0x3] %v18_v4 }

// kernel: elementwise_channel_exp_forward.1
= control target key start
LH: loop header
LB: loop body
LE: loop exit
PB: predicated region body
PF: predicated region fallthrough
CT: control target
= control target key end

     0   :  { %v64_v0 = vlaneseq  ;;  %vm56_vm0 = vcmask 7168   ;;  %v275_v1 = vmov 0.0   ;;  %v276_v4 = vmov 0   ;;  %s338_s4 = inlined_call_operand.vmem [shape: f32[1,1,8,1], index: 4, kind: output, shape index: {1}]   ;;  %s339_s2 = inlined_call_operand.vmem [shape: f32[8,1], index: 2, kind: input, shape index: {}]   ;;  %s340_s0 = inlined_call_operand.vmem [shape: f32[8,256], index: 0, kind: input, shape index: {}]   ;;  %s341_s1 = inlined_call_operand.vmem [shape: f32[8,8], index: 1, kind: input, shape index: {}]   ;;  %s342_s3 = inlined_call_operand.vmem [shape: f32[8,256], index: 3, kind: output, shape index: {0}]  }
   0x1   :  { %57 = vst.msk [vmem:[%s338_s4] sm:$0xff] %vm56_vm0, %v275_v1  ;;  %170 = vmatprep.mubr.f32.mxu0 %v275_v1  ;;  %262 = vset.pattern.permute.xlu0 %v276_v4  ;;  %v61_v5 = vld [vmem:[%s339_s2] sm:$0xff]  ;;  %v59_v16 = vld [vmem:[%s340_s0 + $0x8] sm:$0xff]  ;;  %vm102_vm3 = vcmask 64512   ;;  %vm277_vm6 = vmmov 1  }
   0x2   :  { %v65_v2 = vand.u32 127, %v64_v0  ;;  %v77_v3 = vshrl.u32 %v64_v0, 7  ;;  %99 = vperm.xlu0 %262, %v61_v5   ;;  %v58_v18 = vld [vmem:[%s340_s0] sm:$0xff] }
   0x3   :  { %v60_v19 = vld [vmem:[%s341_s1] sm:$0xff] }
   0x4   :  { %v66_v6 = vadd.s32 128, %v65_v2  ;;  %v82_v7 = vand.u32 3, %v77_v3  ;;  %v70_v8 = vshra.s32 %v65_v2, 4 }
   0x6   :  { %v71_v9 = vshra.s32 %v66_v6, 4  ;;  %v90_v10 = vand.u32 1, %v82_v7  ;;  %v72_v11 = vxor.u32 %v70_v8, %v65_v2 }
   0x8   :  { %v73_v12 = vxor.u32 %v71_v9, %v66_v6  ;;  %v74_v13 = vand.u32 1, %v72_v11  ;;  %v216_v54 = vld [vmem:[%s338_s4] sm:$0xff] }
   0xa   :  { %v75_v14 = vand.u32 1, %v73_v12  ;;  %v91_v15 = vxor.u32 %v90_v10, %v74_v13 }
   0xc   :  { %v92_v17 = vxor.u32 %v90_v10, %v75_v14  ;;  %vm93_vm1 = vcmp.eq.s32.totalorder %v91_v15, 0 }
   0xd   :  { %vm205_vm7 = vmxor %vm93_vm1, %vm277_vm6 }
   0xe   :  { %vm94_vm2 = vcmp.eq.s32.totalorder %v92_v17, 0 }
   0xf   :  { %256 = vmatprep.subr.msk.mxu0 %vm94_vm2, %v59_v16  ;;  %vm206_vm8 = vmxor %vm94_vm2, %vm277_vm6 }
  0x10   :  { %257 = vmatpush1.msk.msra.mxu0 %vm93_vm1, %v58_v18 }
  0x11   :  { %258 = vmatmul.mubr.msk.f32.vlgmr.msra.gmra.mrb[0].mxu0 %vm102_vm3, %v60_v19 }
  0x81   :  { %v100_v20 = vpop.permute.xlu0 %99 }
  0xe4   :  { %v172_v21 = vpop.f32.mrb[0].mxu0 }
  0xe5   :  { %v173_v22 = vadd.f32 %v172_v21, %v100_v20  ;;  %v174_v23 = vpop.f32.mrb[1].mxu0 }
  0xe6   :  { %v175_v24 = vadd.f32 %v174_v23, %v100_v20 }
  0xe7   :  { %v177_v25 = vand.u32 2147483647, %v173_v22  ;;  %vm191_vm4 = vcmp.ge.f32.partialorder %v173_v22, 0.0 }
  0xe8   :  { %v178_v26 = vand.u32 2147483647, %v175_v24  ;;  %vm192_vm5 = vcmp.ge.f32.partialorder %v175_v24, 0.0 }
  0xe9   :  { %v179_v27 = vsub.f32 0.0, %v177_v25 }
  0xea   :  { %v180_v28 = vsub.f32 0.0, %v178_v26 }
  0xeb   :  { %v181_v29 = vmul.f32 1.442695, %v179_v27 }
  0xec   :  { %v183_v30 = vmul.f32 1.442695, %v180_v28 }
  0xed   :  { %263 = vpow2.f32 %v181_v29 }
  0xee   :  { %265 = vpow2.f32 %v183_v30 }
  0xf7   :  { %v264_v31 = vpop.eup %263 }
  0xf8   :  { %v266_v32 = vpop.eup %265  ;;  %v185_v33 = vadd.f32 1.0, %v264_v31 }
  0xf9   :  { %v186_v34 = vadd.f32 1.0, %v266_v32 }
  0xfa   :  { %267 = vrcp.f32 %v185_v33 }
  0xfb   :  { %269 = vrcp.f32 %v186_v34 }
 0x104   :  { %v268_v35 = vpop.eup %267 }
 0x105   :  { %v270_v36 = vpop.eup %269  ;;  %v193_v37 = vmul.f32 %v268_v35, %v264_v31 }
 0x106   :  { %v194_v38 = vmul.f32 %v270_v36, %v266_v32 }
 0x107   :  { %v195_v39 = vsel %vm191_vm4, %v268_v35, %v193_v37 }
 0x108   :  { %v197_v40 = vadd.f32 0.001, %v195_v39  ;;  %v196_v41 = vsel %vm192_vm5, %v270_v36, %v194_v38 }
 0x109   :  { %v198_v42 = vadd.f32 0.001, %v196_v41 }
 0x10a   :  { %v199_v43 = vmul.f32 %v197_v40, %v58_v18  ;;  %271 = vlog2.f32 %v197_v40 }
 0x10b   :  { %v200_v44 = vmul.f32 %v198_v42, %v59_v16  ;;  %273 = vlog2.f32 %v198_v42 }
 0x10c   :  { %v201_v45 = vsel %vm93_vm1, %v58_v18, %v199_v43 }
 0x10d   :  { %203 = vst [vmem:[%s342_s3] sm:$0xff] %v201_v45  ;;  %v202_v46 = vsel %vm94_vm2, %v59_v16, %v200_v44 }
 0x10e   :  { %204 = vst [vmem:[%s342_s3 + $0x8] sm:$0xff] %v202_v46 }
 0x114   :  { %v272_v47 = vpop.eup %271 }
 0x115   :  { %v274_v48 = vpop.eup %273  ;;  %v208_v49 = vmul.f32 0.6931472, %v272_v47 }
 0x116   :  { %v210_v50 = vmul.f32 0.6931472, %v274_v48 }
 0x117   :  { %v211_v51 = vsel %vm205_vm7, %v208_v49, 0.0 }
 0x118   :  { %v212_v52 = vsel %vm206_vm8, %v210_v50, 0.0 }
 0x119   :  { %v213_v53 = vadd.f32 %v212_v52, %v211_v51 }
 0x11b   :  { %214 = vadd.xlane.f32.xlu0 %v213_v53 }
 0x1a8   :  { %v215_v55 = vpop.xlane.xlu0 %214 }
 0x1a9   :  { %v217_v56 = vadd.f32 %v216_v54, %v215_v55 }
 0x1ab   :  { %219 = vst.msk [vmem:[%s338_s4] sm:$0xff] %vm56_vm0, %v217_v56 }

</bundles_post_ra>
